<compile_context>
chip_gen: v7x
topology: tpu7x:2x2x1
jax: 0.10.0
libtpu: 0.0.40
codegen_flags: <defaults>
</compile_context>

<pallas_src>
import math
import jax
import jax.numpy as jnp
from jax.experimental import pallas as pl
from jax.experimental.pallas import tpu as pltpu


NOUT = 8  # padded twin-head output rows; row 0 = x1, row 1 = x2, rows 2..7 = 0


# ----------------------------- Pallas kernel ----------------------------------
def make_qnet_kernel(H2, A):
    nt = (((1,), (1,)), ((), ()))   # W (M,K) x X (N,K) -> (M,N)  (contract last dims)
    nn = (((1,), (0,)), ((), ()))   # standard matmul

    def kernel(s_ref, at_ref, w04t_ref, wslab_ref, cols_ref, o_ref):
        s16 = s_ref[...].astype(jnp.bfloat16)         # (Bt, D)
        at = at_ref[...]                              # (A, Bt)   f32
        cols = cols_ref[...]                          # (2H, 4+A) f32 (one load)
        b04, b15, b26 = cols[:, 0:1], cols[:, 1:2], cols[:, 2:3]
        b37 = cols[:NOUT, 3:4]                        # (8, 1)

        w04t = w04t_ref[...]                          # (2H, D)   bf16
        w15ht = wslab_ref[0:H2, :]                    # (2H, 2H)  bf16
        w26t = wslab_ref[H2:2 * H2, :]                # (2H, 2H)  bf16
        w37t = wslab_ref[2 * H2:2 * H2 + NOUT, :]     # (8, 2H)   bf16

        # layer 0 || 4 : hT = relu(W04^T @ s^T + b04)    (NT dot; batch on lanes)
        h = jax.lax.dot_general(w04t, s16, nt, preferred_element_type=jnp.float32)
        h = jnp.maximum(h + b04, 0.0)                 # (2H, Bt) f32

        # layer 1 || 5 : hT = relu(W15h^T @ hT + W15a^T @ a^T + b15)
        acc = jax.lax.dot_general(w15ht, h.astype(jnp.bfloat16), nn,
                                  preferred_element_type=jnp.float32)
        for k in range(A):                            # K=A outer products on the VPU
            acc = acc + cols[:, 4 + k:5 + k] * at[k:k + 1, :]
        h = jnp.maximum(acc + b15, 0.0)

        # layer 2 || 6
        h = jax.lax.dot_general(w26t, h.astype(jnp.bfloat16), nn,
                                preferred_element_type=jnp.float32)
        h = jnp.maximum(h + b26, 0.0)

        # layer 3 || 7 : (8, Bt) lane-dense store; rows 0/1 = x1/x2
        x = jax.lax.dot_general(w37t, h.astype(jnp.bfloat16), nn,
                                preferred_element_type=jnp.float32)
        o_ref[...] = x + b37

    return kernel


# ------------------------------ wrapper ---------------------------------------
def _round_up(n, m):
    return (n + m - 1) // m * m


def _default_num_blocks():
    # v7x has two TensorCores sharing the grid; v5e/v6e have one, so a batch
    # grid there is a purely serial loop (per perf review) -> skip it.
    try:
        kind = jax.devices()[0].device_kind.lower()
        if "v7" in kind or "7x" in kind:
            return 2
    except Exception:
        pass
    return 1


def qnetwork_forward(state, action, params, *, num_blocks=None):
    """state: (B, num_inputs, seq, num_actions); action: (B, num_actions).

    Returns (x1, x2), each (B, 1)."""
    w04t, wslab, cols = params
    B = state.shape[0]
    D = state.shape[1] * state.shape[2] * state.shape[3]
    A = action.shape[1]
    H2 = w04t.shape[0]

    s = state.reshape(B, D)      # metadata-only; permute folded into w04t columns
    at = action.T                # (A, B): batch rides the lane dimension

    if num_blocks is None:
        num_blocks = _default_num_blocks()

    kernel = make_qnet_kernel(H2, A)
    flops = int(2 * B * H2 * (D + 2 * H2 + A + NOUT))
    bytes_accessed = int(4 * (B * D + A * B + cols.size + NOUT * B)
                         + 2 * (w04t.size + wslab.size))
    cost = pl.CostEstimate(flops=flops, transcendentals=0,
                           bytes_accessed=bytes_accessed)

    if num_blocks > 1 and B > 128:
        # Megacore path (v7x): exactly `num_blocks` grid steps over the batch,
        # batch padded to a lane-aligned multiple so the lane-dense tiling holds.
        tile_b = _round_up(pl.cdiv(B, num_blocks), 128)
        bp = tile_b * num_blocks
        if bp != B:
            s = jnp.pad(s, ((0, bp - B), (0, 0)))
            at = jnp.pad(at, ((0, 0), (0, bp - B)))
        out = pl.pallas_call(
            kernel,
            out_shape=jax.ShapeDtypeStruct((NOUT, bp), jnp.float32),
            grid=(num_blocks,),
            in_specs=[
                pl.BlockSpec((tile_b, D), lambda i: (i, 0)),
                pl.BlockSpec((A, tile_b), lambda i: (0, i)),
                pl.BlockSpec(w04t.shape, lambda i: (0, 0)),
                pl.BlockSpec(wslab.shape, lambda i: (0, 0)),
                pl.BlockSpec(cols.shape, lambda i: (0, 0)),
            ],
            out_specs=pl.BlockSpec((NOUT, tile_b), lambda i: (0, i)),
            compiler_params=pltpu.CompilerParams(
                dimension_semantics=("parallel",)),
            cost_estimate=cost,
        )(s, at, w04t, wslab, cols)
        out = out[:, :B]
    else:
        # Single-shot path (v5e/v6e, or any batch that fits VMEM): no grid.
        vmem = pl.BlockSpec(memory_space=pltpu.MemorySpace.VMEM)
        out = pl.pallas_call(
            kernel,
            out_shape=jax.ShapeDtypeStruct((NOUT, B), jnp.float32),
            in_specs=[vmem] * 5,
            out_specs=vmem,
            cost_estimate=cost,
        )(s, at, w04t, wslab, cols)

    return out[0:1, :].T, out[1:2, :].T


# ------------------------- deterministic param init ---------------------------
def xavier_uniform(key, fan_in, fan_out):
    bound = math.sqrt(6.0 / (fan_in + fan_out))
    # stored as (in, out) so x @ W == PyTorch x @ W.T
    return jax.random.uniform(key, (fan_in, fan_out), jnp.float32, -bound, bound)


def init_raw_params(key, D, A, H):
    ks = jax.random.split(key, 8)
    zH = jnp.zeros((H,), jnp.float32)
    z1 = jnp.zeros((1,), jnp.float32)
    return (
        xavier_uniform(ks[0], D, H), zH,          # linear0
        xavier_uniform(ks[1], H + A, H), zH,      # linear1
        xavier_uniform(ks[2], H, H), zH,          # linear2
        xavier_uniform(ks[3], H, 1), z1,          # linear3
        xavier_uniform(ks[4], D, H), zH,          # linear4
        xavier_uniform(ks[5], H + A, H), zH,      # linear5
        xavier_uniform(ks[6], H, H), zH,          # linear6
        xavier_uniform(ks[7], H, 1), z1,          # linear7
    )


def pack_params(raw, num_inputs, num_actions, seq_len, hidden):
    """Fuse twin heads, fold the state permute, transpose to output-major (bf16)."""
    (W0, b0, W1, b1, W2, b2, W3, b3,
     W4, b4, W5, b5, W6, b6, W7, b7) = raw
    I, S, A, H = num_inputs, seq_len, num_actions, hidden
    D, H2 = I * A * S, 2 * H

    # fold permute([0,2,1,3]): natural flat (i,s,a) -> permuted flat (s,i,a)
    nat = jnp.arange(D)
    in_idx = nat // (S * A)
    seq_idx = (nat % (S * A)) // A
    act_idx = nat % A
    perm = seq_idx * (I * A) + in_idx * A + act_idx
    W0p, W4p = W0[perm], W4[perm]

    # output-major (transposed) weights so batch sits on lanes inside the kernel
    w04t = jnp.concatenate([W0p, W4p], axis=1).T                     # (2H, D)

    zHH = jnp.zeros((H, H), jnp.float32)
    w15ht = jnp.block([[W1[:H].T, zHH], [zHH, W5[:H].T]])            # (2H, 2H)
    w26t = jnp.block([[W2.T, zHH], [zHH, W6.T]])                     # (2H, 2H)
    w37t = jnp.zeros((NOUT, H2), jnp.float32)
    w37t = w37t.at[0, :H].set(W3[:, 0]).at[1, H:].set(W7[:, 0])      # (8, 2H)

    wslab = jnp.concatenate([w15ht, w26t, w37t], axis=0)             # (2*2H+8, 2H)

    # f32 column table: biases (cols 0-3) + action weight columns (cols 4..4+A-1)
    cols = jnp.zeros((H2, 4 + A), jnp.float32)
    cols = cols.at[:, 0].set(jnp.concatenate([b0, b4]))
    cols = cols.at[:, 1].set(jnp.concatenate([b1, b5]))
    cols = cols.at[:, 2].set(jnp.concatenate([b2, b6]))
    cols = cols.at[0, 3].set(b3[0]).at[1, 3].set(b7[0])
    for k in range(A):
        cols = cols.at[:, 4 + k].set(jnp.concatenate([W1[H + k], W5[H + k]]))

    return (w04t.astype(jnp.bfloat16), wslab.astype(jnp.bfloat16), cols)


# ------------------------------- reference ------------------------------------
def reference_forward(state, action, raw):
    (W0, b0, W1, b1, W2, b2, W3, b3,
     W4, b4, W5, b5, W6, b6, W7, b7) = raw
    B = state.shape[0]
    s = jnp.transpose(state, (0, 2, 1, 3)).reshape(B, -1)

    def head(WA, bA, WB, bB, WC, bC, WD, bD):
        h = jax.nn.relu(s @ WA + bA)
        xu = jnp.concatenate([h, action], axis=1)
        h = jax.nn.relu(xu @ WB + bB)
        h = jax.nn.relu(h @ WC + bC)
        return h @ WD + bD

    return (head(W0, b0, W1, b1, W2, b2, W3, b3),
            head(W4, b4, W5, b5, W6, b6, W7, b7))


# --------------------------------- main ----------------------------------------
if __name__ == "__main__":
    B, num_inputs, num_actions, seq_len, hidden = 2, 4, 2, 8, 32
    D = num_inputs * num_actions * seq_len      # 64 (identity-encoder next_dim)

    key = jax.random.PRNGKey(0)
    (k_state, k_action, k_params,
     k_s2, k_a2, k_s3, k_a3) = jax.random.split(key, 7)

    raw = init_raw_params(k_params, D, num_actions, hidden)
    params = pack_params(raw, num_inputs, num_actions, seq_len, hidden)

    TOL = dict(atol=5e-2, rtol=5e-2)   # bf16 matmuls with f32 accumulation

    # --- small batch: single-shot (no-grid) path ---
    state = jax.random.normal(k_state, (B, num_inputs, seq_len, num_actions),
                              jnp.float32)
    action = jax.random.normal(k_action, (B, num_actions), jnp.float32)
    x1, x2 = qnetwork_forward(state, action, params, num_blocks=1)
    jax.block_until_ready((x1, x2))
    r1, r2 = reference_forward(state, action, raw)
    assert x1.shape == (B, 1) and x2.shape == (B, 1)
    assert jnp.allclose(x1, r1, **TOL) and jnp.allclose(x2, r2, **TOL)

    # --- larger batch: two-step (megacore-style) grid path, lane-tiled batch ---
    B2 = 256
    state2 = jax.random.normal(k_s2, (B2, num_inputs, seq_len, num_actions),
                               jnp.float32)
    action2 = jax.random.normal(k_a2, (B2, num_actions), jnp.float32)
    y1, y2 = qnetwork_forward(state2, action2, params, num_blocks=2)
    jax.block_until_ready((y1, y2))
    s1, s2 = reference_forward(state2, action2, raw)
    assert y1.shape == (B2, 1) and y2.shape == (B2, 1)
    assert jnp.allclose(y1, s1, **TOL) and jnp.allclose(y2, s2, **TOL)

    # --- odd batch: grid path with lane padding (B not a multiple of 128) ---
    B3 = 200
    state3 = jax.random.normal(k_s3, (B3, num_inputs, seq_len, num_actions),
                               jnp.float32)
    action3 = jax.random.normal(k_a3, (B3, num_actions), jnp.float32)
    z1, z2 = qnetwork_forward(state3, action3, params, num_blocks=2)
    jax.block_until_ready((z1, z2))
    t1, t2 = reference_forward(state3, action3, raw)
    assert z1.shape == (B3, 1) and z2.shape == (B3, 1)
    assert jnp.allclose(z1, t1, **TOL) and jnp.allclose(z2, t2, **TOL)

    print("KERNEL_OK")
</pallas_src>

<mosaic_0001>
module attributes {stable_mosaic.version = 11 : i64} {
  func.func @kernel(%arg0: memref<2x64xf32, #tpu.memory_space<vmem>>, %arg1: memref<2x2xf32, #tpu.memory_space<vmem>>, %arg2: memref<64x64xbf16, #tpu.memory_space<vmem>>, %arg3: memref<136x64xbf16, #tpu.memory_space<vmem>>, %arg4: memref<64x6xf32, #tpu.memory_space<vmem>>, %arg5: memref<8x2xf32, #tpu.memory_space<vmem>>) attributes {dimension_semantics = [], scalar_prefetch = 0 : i64, scratch_operands = 0 : i64, tpu.core_type = #tpu.core_type<tc>} {
    %c0 = arith.constant 0 : index
    %c0_0 = arith.constant 0 : index
    %0 = vector.load %arg0[%c0, %c0_0] : memref<2x64xf32, #tpu.memory_space<vmem>>, vector<2x64xf32>
    %1 = arith.truncf %0 : vector<2x64xf32> to vector<2x64xbf16>
    %c0_1 = arith.constant 0 : index
    %c0_2 = arith.constant 0 : index
    %2 = vector.load %arg1[%c0_1, %c0_2] : memref<2x2xf32, #tpu.memory_space<vmem>>, vector<2x2xf32>
    %c0_3 = arith.constant 0 : index
    %c0_4 = arith.constant 0 : index
    %3 = vector.load %arg4[%c0_3, %c0_4] : memref<64x6xf32, #tpu.memory_space<vmem>>, vector<64x6xf32>
    %4 = vector.extract_strided_slice %3 {offsets = [0, 0], sizes = [64, 1], strides = [1, 1]} : vector<64x6xf32> to vector<64x1xf32>
    %5 = vector.extract_strided_slice %3 {offsets = [0, 1], sizes = [64, 1], strides = [1, 1]} : vector<64x6xf32> to vector<64x1xf32>
    %6 = vector.extract_strided_slice %3 {offsets = [0, 2], sizes = [64, 1], strides = [1, 1]} : vector<64x6xf32> to vector<64x1xf32>
    %7 = vector.extract_strided_slice %3 {offsets = [0, 3], sizes = [8, 1], strides = [1, 1]} : vector<64x6xf32> to vector<8x1xf32>
    %c0_5 = arith.constant 0 : index
    %c0_6 = arith.constant 0 : index
    %8 = vector.load %arg2[%c0_5, %c0_6] : memref<64x64xbf16, #tpu.memory_space<vmem>>, vector<64x64xbf16>
    %c0_7 = arith.constant 0 : index
    %c0_8 = arith.constant 0 : index
    %9 = vector.load %arg3[%c0_7, %c0_8] : memref<136x64xbf16, #tpu.memory_space<vmem>>, vector<64x64xbf16>
    %c64 = arith.constant 64 : index
    %c0_9 = arith.constant 0 : index
    %10 = vector.load %arg3[%c64, %c0_9] : memref<136x64xbf16, #tpu.memory_space<vmem>>, vector<64x64xbf16>
    %c128 = arith.constant 128 : index
    %c0_10 = arith.constant 0 : index
    %11 = vector.load %arg3[%c128, %c0_10] : memref<136x64xbf16, #tpu.memory_space<vmem>>, vector<8x64xbf16>
    %cst = arith.constant dense<0.000000e+00> : vector<64x2xf32>
    %12 = tpu.matmul %8, %1, %cst {dimension_numbers = #tpu.dot_dimension_numbers<[1], [1], [0], [0], [0, 0, 1, 0], [], []>} : vector<64x64xbf16>, vector<2x64xbf16>, vector<64x2xf32> -> vector<64x2xf32>
    %13 = vector.broadcast %4 : vector<64x1xf32> to vector<64x2xf32>
    %14 = arith.addf %12, %13 : vector<64x2xf32>
    %cst_11 = arith.constant 0.000000e+00 : f32
    %15 = vector.broadcast %cst_11 : f32 to vector<64x2xf32>
    %16 = arith.maximumf %14, %15 : vector<64x2xf32>
    %17 = arith.truncf %16 : vector<64x2xf32> to vector<64x2xbf16>
    %cst_12 = arith.constant dense<0.000000e+00> : vector<64x2xf32>
    %18 = tpu.matmul %9, %17, %cst_12 {dimension_numbers = #tpu.dot_dimension_numbers<[1], [0], [0], [1], [0, 0, 1, 1], [], []>} : vector<64x64xbf16>, vector<64x2xbf16>, vector<64x2xf32> -> vector<64x2xf32>
    %19 = vector.extract_strided_slice %3 {offsets = [0, 4], sizes = [64, 1], strides = [1, 1]} : vector<64x6xf32> to vector<64x1xf32>
    %20 = vector.extract_strided_slice %2 {offsets = [0, 0], sizes = [1, 2], strides = [1, 1]} : vector<2x2xf32> to vector<1x2xf32>
    %21 = vector.broadcast %19 : vector<64x1xf32> to vector<64x2xf32>
    %22 = vector.broadcast %20 : vector<1x2xf32> to vector<64x2xf32>
    %23 = arith.mulf %21, %22 : vector<64x2xf32>
    %24 = arith.addf %18, %23 : vector<64x2xf32>
    %25 = vector.extract_strided_slice %3 {offsets = [0, 5], sizes = [64, 1], strides = [1, 1]} : vector<64x6xf32> to vector<64x1xf32>
    %26 = vector.extract_strided_slice %2 {offsets = [1, 0], sizes = [1, 2], strides = [1, 1]} : vector<2x2xf32> to vector<1x2xf32>
    %27 = vector.broadcast %25 : vector<64x1xf32> to vector<64x2xf32>
    %28 = vector.broadcast %26 : vector<1x2xf32> to vector<64x2xf32>
    %29 = arith.mulf %27, %28 : vector<64x2xf32>
    %30 = arith.addf %24, %29 : vector<64x2xf32>
    %31 = vector.broadcast %5 : vector<64x1xf32> to vector<64x2xf32>
    %32 = arith.addf %30, %31 : vector<64x2xf32>
    %cst_13 = arith.constant 0.000000e+00 : f32
    %33 = vector.broadcast %cst_13 : f32 to vector<64x2xf32>
    %34 = arith.maximumf %32, %33 : vector<64x2xf32>
    %35 = arith.truncf %34 : vector<64x2xf32> to vector<64x2xbf16>
    %cst_14 = arith.constant dense<0.000000e+00> : vector<64x2xf32>
    %36 = tpu.matmul %10, %35, %cst_14 {dimension_numbers = #tpu.dot_dimension_numbers<[1], [0], [0], [1], [0, 0, 1, 1], [], []>} : vector<64x64xbf16>, vector<64x2xbf16>, vector<64x2xf32> -> vector<64x2xf32>
    %37 = vector.broadcast %6 : vector<64x1xf32> to vector<64x2xf32>
    %38 = arith.addf %36, %37 : vector<64x2xf32>
    %cst_15 = arith.constant 0.000000e+00 : f32
    %39 = vector.broadcast %cst_15 : f32 to vector<64x2xf32>
    %40 = arith.maximumf %38, %39 : vector<64x2xf32>
    %41 = arith.truncf %40 : vector<64x2xf32> to vector<64x2xbf16>
    %cst_16 = arith.constant dense<0.000000e+00> : vector<8x2xf32>
    %42 = tpu.matmul %11, %41, %cst_16 {dimension_numbers = #tpu.dot_dimension_numbers<[1], [0], [0], [1], [0, 0, 1, 1], [], []>} : vector<8x64xbf16>, vector<64x2xbf16>, vector<8x2xf32> -> vector<8x2xf32>
    %43 = vector.broadcast %7 : vector<8x1xf32> to vector<8x2xf32>
    %44 = arith.addf %42, %43 : vector<8x2xf32>
    %c0_17 = arith.constant 0 : index
    %c0_18 = arith.constant 0 : index
    %45 = vector.load %arg5[%c0_17, %c0_18] : memref<8x2xf32, #tpu.memory_space<vmem>>, vector<8x2xf32>
    tpu.vector_store %arg5[%c0_17, %c0_18], %44 {strides = array<i32>} : memref<8x2xf32, #tpu.memory_space<vmem>>, vector<8x2xf32>,
    return
  }
}

</mosaic_0001>

<bundles_post_ra>
// kernel: tpu_custom_call.1
= control target key start
LH: loop header
LB: loop body
LE: loop exit
PB: predicated region body
PF: predicated region fallthrough
CT: control target
= control target key end

     0   :  { %vm117_vm0 = vcmask 523264   ;;  %v794_v1 = vmov 0   ;;  %v795_v17 = vmov 4   ;;  %v796_v18 = vmov 5   ;;  %s979_s0 = inlined_call_operand.vmem [shape: f32[2,64], index: 0, kind: input, shape index: {}]   ;;  %s980_s2 = inlined_call_operand.vmem [shape: bf16[64,64], index: 2, kind: input, shape index: {}]   ;;  %s981_s4 = inlined_call_operand.vmem [shape: f32[64,6], index: 4, kind: input, shape index: {}]   ;;  %s982_s3 = inlined_call_operand.vmem [shape: bf16[136,64], index: 3, kind: input, shape index: {}]   ;;  %s983_s1 = inlined_call_operand.vmem [shape: f32[2,2], index: 1, kind: input, shape index: {}]   ;;  %s984_s5 = inlined_call_operand.vmem [shape: f32[8,2], index: 5, kind: output, shape index: {}]  }
   0x1   :  { %v21_v0 = vld [vmem:[%s979_s0] sm:$0x3]  ;;  %763 = vset.pattern.permute.xlu0 %v794_v1  ;;  %764 = vset.pattern.permute.xlu1 %v794_v1  ;;  %v849_v6 = vld [vmem:[%s981_s4 + $0x10] sm:$0xff]  ;;  %v856_v7 = vld [vmem:[%s981_s4 + $0x8] sm:$0xff]  ;;  %v797_v19 = vmov 1   ;;  %v798_v60 = vmov 2  }
   0x2   :  { %v22_v2 = vpack.c.bf16 %v21_v0, %v21_v0  ;;  %v782_v3 = vld [vmem:[%s980_s2] sm:$0xff]   ;;  %69 = vperm.xlu1 %764, %v849_v6   ;;  %v861_v8 = vld [vmem:[%s981_s4 + $0x18] sm:$0xff]  ;;  %v783_v9 = vld [vmem:[%s980_s2 + $0x8] sm:$0xff]   ;;  %vm800_vm1 = vmmov 0   ;;  %vm643_vm2 = vcmask 15360  }
   0x3   :  { %702 = vmatprep.mubr.msk.bf16.mxu0 %vm117_vm0, %v782_v3  ;;  %v844_v5 = vld [vmem:[%s981_s4] sm:$0xff]  ;;  %v784_v10 = vld [vmem:[%s980_s2 + $0x10] sm:$0xff]   ;;  %v879_v12 = vld [vmem:[%s981_s4 + $0x28] sm:$0xff] }
   0x4   :  { %754 = vmatprep.subr.msk.bf16.mxu0 %vm117_vm0, %v22_v2  ;;  %v131_v4 = vsel %vm117_vm0, %v22_v2, 0  ;;  %59 = vperm.xlu0 %763, %v844_v5   ;;  %v874_v11 = vld [vmem:[%s981_s4 + $0x20] sm:$0xff]  ;;  %v888_v13 = vld [vmem:[%s981_s4 + $0x30] sm:$0xff]  ;;  %v893_v14 = vld [vmem:[%s981_s4 + $0x38] sm:$0xff] }
   0x5   :  { %701 = vmatpush3.bf16.xpose.msra.mxu0 %v131_v4  ;;  %v785_v15 = vld [vmem:[%s980_s2 + $0x18] sm:$0xff]   ;;  %v786_v16 = vld [vmem:[%s982_s3] sm:$0xff]   ;;  %v787_v56 = vld [vmem:[%s982_s3 + $0x8] sm:$0xff]  }
   0x6   :  { %74 = vperm.xlu1 %764, %v861_v8   ;;  %718 = vmatprep.mubr.msk.bf16.mxu1 %vm117_vm0, %v786_v16  ;;  %v788_v57 = vld [vmem:[%s982_s3 + $0x10] sm:$0xff]   ;;  %v789_v58 = vld [vmem:[%s982_s3 + $0x18] sm:$0xff]   ;;  %v790_v59 = vld [vmem:[%s982_s3 + $0x20] sm:$0xff]  }
   0x8   :  { %64 = vperm.xlu0 %763, %v856_v7  }
   0xa   :  { %84 = vperm.xlu1 %764, %v879_v12  }
   0xc   :  { %703 = vmatmul.mubr.msk.bf16.vlgmr.msra.gmra.mrb[0].mxu0 %vm117_vm0, %v783_v9  ;;  %79 = vperm.xlu0 %763, %v874_v11  }
   0xd   :  { %706 = vmatprep.mubr.msk.bf16.mxu0 %vm117_vm0, %v784_v10 }
   0xe   :  { %94 = vperm.xlu1 %764, %v893_v14  }
  0x10   :  { %89 = vperm.xlu0 %763, %v888_v13  }
  0x12   :  { %765 = vset.pattern.permute.xlu1 %v795_v17 }
  0x13   :  { %215 = vperm.xlu1 %765, %v856_v7  }
  0x14   :  { %707 = vmatmul.mubr.msk.bf16.gmra.mrb[4].mxu0 %vm117_vm0, %v785_v15  ;;  %767 = vset.pattern.permute.xlu0 %v796_v18 }
  0x15   :  { %356 = vperm.xlu0 %767, %v856_v7   ;;  %734 = vmatprep.mubr.msk.bf16.mxu0 %vm117_vm0, %v790_v59 }
  0x17   :  { %766 = vset.pattern.permute.xlu1 %v796_v18 }
  0x18   :  { %352 = vperm.xlu1 %766, %v844_v5  }
  0x19   :  { %360 = vperm.xlu0 %767, %v849_v6  }
  0x1c   :  { %768 = vset.pattern.permute.xlu1 %v795_v17 }
  0x1d   :  { %769 = vset.pattern.permute.xlu0 %v795_v17  ;;  %219 = vperm.xlu1 %768, %v849_v6  }
  0x1e   :  { %211 = vperm.xlu0 %769, %v844_v5  }
  0x21   :  { %223 = vperm.xlu1 %768, %v861_v8  }
  0x22   :  { %231 = vperm.xlu0 %769, %v879_v12  }
  0x25   :  { %770 = vset.pattern.permute.xlu1 %v796_v18 }
  0x26   :  { %239 = vperm.xlu0 %769, %v893_v14   ;;  %364 = vperm.xlu1 %770, %v861_v8  }
  0x2a   :  { %776 = vset.pattern.permute.xlu0 %v797_v19  ;;  %771 = vset.pattern.permute.xlu1 %v797_v19 }
  0x2b   :  { %404 = vperm.xlu0 %776, %v844_v5   ;;  %408 = vperm.xlu1 %771, %v856_v7  }
  0x2f   :  { %412 = vperm.xlu0 %776, %v849_v6   ;;  %772 = vset.pattern.permute.xlu1 %v795_v17 }
  0x30   :  { %227 = vperm.xlu1 %772, %v874_v11  }
  0x33   :  { %420 = vperm.xlu0 %776, %v874_v11  }
  0x34   :  { %773 = vset.pattern.permute.xlu1 %v796_v18 }
  0x35   :  { %368 = vperm.xlu1 %773, %v874_v11  }
  0x37   :  { %432 = vperm.xlu0 %776, %v893_v14  }
  0x39   :  { %372 = vperm.xlu1 %773, %v879_v12  }
  0x3b   :  { %780 = vset.pattern.permute.xlu0 %v798_v60 }
  0x3c   :  { %460 = vperm.xlu0 %780, %v856_v7  }
  0x3d   :  { %774 = vset.pattern.permute.xlu1 %v797_v19 }
  0x3e   :  { %416 = vperm.xlu1 %774, %v861_v8  }
  0x40   :  { %472 = vperm.xlu0 %780, %v874_v11  }
  0x42   :  { %775 = vset.pattern.permute.xlu1 %v795_v17 }
  0x43   :  { %235 = vperm.xlu1 %775, %v888_v13  }
  0x44   :  { %480 = vperm.xlu0 %780, %v888_v13  }
  0x47   :  { %777 = vset.pattern.permute.xlu1 %v796_v18  ;;  %v23_v18 = vld [vmem:[%s983_s1] sm:$0x3] }
  0x48   :  { %376 = vperm.xlu1 %777, %v888_v13  }
  0x4c   :  { %380 = vperm.xlu1 %777, %v893_v14  }
  0x50   :  { %778 = vset.pattern.permute.xlu1 %v797_v19 }
  0x51   :  { %424 = vperm.xlu1 %778, %v879_v12  }
  0x55   :  { %428 = vperm.xlu1 %778, %v888_v13   ;;  %v242_v13 = vlaneseq }
  0x59   :  { %779 = vset.pattern.permute.xlu1 %v798_v60 }
  0x5a   :  { %456 = vperm.xlu1 %779, %v844_v5  }
  0x5e   :  { %464 = vperm.xlu1 %779, %v849_v6  }
  0x62   :  { %468 = vperm.xlu1 %779, %v861_v8  }
  0x66   :  { %476 = vperm.xlu1 %779, %v879_v12   ;;  %v243_v12 = vshrl.u32 %v242_v13, 7 }
  0x68   :  { %v385_v19 = vsub.s32 1, %v243_v12 }
  0x6a   :  { %484 = vperm.xlu1 %779, %v893_v14   ;;  %v244_v14 = vsub.s32 0, %v243_v12 }
  0x81   :  { %v70_v21 = vpop.permute.xlu1 %69 }
  0x83   :  { %v60_v20 = vpop.permute.xlu0 %59 }
  0x85   :  { %v75_v23 = vpop.permute.xlu1 %74 }
  0x87   :  { %v65_v22 = vpop.permute.xlu0 %64 }
  0x89   :  { %v85_v32 = vpop.permute.xlu1 %84 }
  0x8b   :  { %v80_v27 = vpop.permute.xlu0 %79 }
  0x8d   :  { %v95_v44 = vpop.permute.xlu1 %94 }
  0x8f   :  { %v90_v39 = vpop.permute.xlu0 %89 }
  0x92   :  { %v216_v61 = vpop.permute.xlu1 %215 }
  0x94   :  { %v357_v4 = vpop.permute.xlu0 %356 }
  0x97   :  { %v353_v62 = vpop.permute.xlu1 %352 }
  0x98   :  { %v361_v6 = vpop.permute.xlu0 %360 }
  0x9c   :  { %v220_v63 = vpop.permute.xlu1 %219 }
  0x9d   :  { %v212_v10 = vpop.permute.xlu0 %211 }
  0xa0   :  { %v224_v0 = vpop.permute.xlu1 %223 }
  0xa1   :  { %v232_v11 = vpop.permute.xlu0 %231 }
  0xa5   :  { %v365_v1 = vpop.permute.xlu1 %364  ;;  %v240_v16 = vpop.permute.xlu0 %239 }
  0xaa   :  { %v409_v2 = vpop.permute.xlu1 %408 }
  0xaf   :  { %v228_v3 = vpop.permute.xlu1 %227 }
  0xb4   :  { %v369_v7 = vpop.permute.xlu1 %368 }
  0xb8   :  { %v953_v9 = vpop.permute.xlu1 %372 }
  0xbd   :  { %v417_v8 = vpop.permute.xlu1 %416 }
  0xc2   :  { %v236_v15 = vpop.permute.xlu1 %235 }
  0xc7   :  { %v377_v17 = vpop.permute.xlu1 %376 }
  0xdf   :  { %v704_v24 = vpop.f32.mrb[0].mxu0 }
  0xe0   :  { %v176_v25 = vadd.f32 %v704_v24, %v70_v21  ;;  %v167_v26 = vpop.f32.mrb[1].mxu0  ;;  %v245_v21 = vrot.slane %v23_v18, %v244_v14 }
  0xe1   :  { %v168_v28 = vadd.f32 %v167_v26, %v60_v20  ;;  %v705_v29 = vpop.f32.mrb[2].mxu0  ;;  %v405_v20 = vpop.permute.xlu0 %404 }
  0xe2   :  { %v179_v30 = vadd.f32 %v705_v29, %v75_v23  ;;  %v170_v31 = vpop.f32.mrb[3].mxu0  ;;  %v200_v34 = vmax.f32 %v176_v25, 0.0  ;;  %v381_v23 = vpop.permute.xlu1 %380  ;;  %v248_v24 = vmul.f32 %v245_v21, %v220_v63  ;;  %v246_v25 = vmul.f32 %v245_v21, %v212_v10 }
  0xe3   :  { %v171_v33 = vadd.f32 %v170_v31, %v65_v22  ;;  %v198_v36 = vmax.f32 %v168_v28, 0.0  ;;  %v386_v22 = vrot.slane %v23_v18, %v385_v19  ;;  %v247_v31 = vmul.f32 %v245_v21, %v216_v61 }
  0xe4   :  { %v201_v35 = vmax.f32 %v179_v30, 0.0 }
  0xe5   :  { %v199_v37 = vmax.f32 %v171_v33, 0.0  ;;  %v389_v28 = vmul.f32 %v386_v22, %v361_v6  ;;  %v413_v33 = vpop.permute.xlu0 %412  ;;  %v391_v61 = vmul.f32 %v386_v22, %v369_v7  ;;  %v394_v6 = vmul.f32 %v386_v22, %v381_v23 }
  0xe6   :  { %v207_v38 = vpack.c.bf16 %v201_v35, %v200_v34  ;;  %v392_v13 = vmul.f32 %v386_v22, %v953_v9 }
  0xe7   :  { %v708_v40 = vpop.f32.mrb[4].mxu0  ;;  %v206_v41 = vpack.c.bf16 %v199_v37, %v198_v36  ;;  %v390_v36 = vmul.f32 %v386_v22, %v365_v1 }
  0xe8   :  { %v192_v42 = vadd.f32 %v708_v40, %v90_v39  ;;  %v183_v43 = vpop.f32.mrb[5].mxu0  ;;  %v388_v40 = vmul.f32 %v386_v22, %v357_v4 }
  0xe9   :  { %v184_v45 = vadd.f32 %v183_v43, %v80_v27  ;;  %v709_v46 = vpop.f32.mrb[6].mxu0  ;;  %710 = vmatprep.subr.bf16.mxu1 %v206_v41  ;;  %v249_v27 = vmul.f32 %v245_v21, %v224_v0  ;;  %v425_v43 = vpop.permute.xlu1 %424 }
  0xea   :  { %v195_v47 = vadd.f32 %v709_v46, %v95_v44  ;;  %v186_v48 = vpop.f32.mrb[7].mxu0  ;;  %711 = vmatpush3.bf16.msra.mxu1 %v206_v41  ;;  %v204_v50 = vmax.f32 %v192_v42, 0.0 }
  0xeb   :  { %v187_v49 = vadd.f32 %v186_v48, %v85_v32  ;;  %712 = vmatprep.subr.bf16.mxu1 %v207_v38  ;;  %v202_v52 = vmax.f32 %v184_v45, 0.0  ;;  %v387_v32 = vmul.f32 %v386_v22, %v353_v62  ;;  %v252_v48 = vmul.f32 %v245_v21, %v236_v15 }
  0xec   :  { %v205_v51 = vmax.f32 %v195_v47, 0.0 }
  0xed   :  { %v203_v53 = vmax.f32 %v187_v49, 0.0  ;;  %v429_v4 = vpop.permute.xlu1 %428 }
  0xee   :  { %v209_v54 = vpack.c.bf16 %v205_v51, %v204_v50  ;;  %713 = vmatpush3.bf16.msra.mxu1 %v207_v38  ;;  %v250_v50 = vmul.f32 %v245_v21, %v228_v3  ;;  %v251_v51 = vmul.f32 %v245_v21, %v232_v11 }
  0xef   :  { %v208_v55 = vpack.c.bf16 %v203_v53, %v202_v52  ;;  %v253_v52 = vmul.f32 %v245_v21, %v240_v16  ;;  %v421_v53 = vpop.permute.xlu0 %420 }
  0xf1   :  { %714 = vmatprep.subr.bf16.mxu1 %v208_v55 }
  0xf2   :  { %715 = vmatpush3.bf16.msra.mxu1 %v208_v55 }
  0xf3   :  { %716 = vmatprep.subr.bf16.mxu1 %v209_v54  ;;  %v433_v14 = vpop.permute.xlu0 %432 }
  0xf6   :  { %717 = vmatpush3.bf16.msra.mxu1 %v209_v54 }
  0xf9   :  { %719 = vmatmul.mubr.msk.bf16.vlgmr.msra.gmra.mrb[0].mxu1 %vm117_vm0, %v787_v56  ;;  %v393_v56 = vmul.f32 %v386_v22, %v377_v17  ;;  %v791_v22 = vld [vmem:[%s982_s3 + $0x28] sm:$0xff]  }
  0xfa   :  { %722 = vmatprep.mubr.msk.bf16.mxu1 %vm117_vm0, %v788_v57 }
 0x101   :  { %723 = vmatmul.mubr.msk.bf16.gmra.mrb[4].mxu1 %vm117_vm0, %v789_v58 }
 0x1cc   :  { %v720_v26 = vpop.f32.mrb[0].mxu1 }
 0x1cd   :  { %v329_v29 = vadd.f32 %v720_v26, %v248_v24  ;;  %v320_v30 = vpop.f32.mrb[1].mxu1 }
 0x1ce   :  { %v321_v34 = vadd.f32 %v320_v30, %v246_v25  ;;  %v721_v35 = vpop.f32.mrb[2].mxu1  ;;  %v801_v30 = vmov 3  }
 0x1cf   :  { %v397_v37 = vadd.f32 %v389_v28, %v329_v29  ;;  %v332_v38 = vadd.f32 %v721_v35, %v249_v27  ;;  %v323_v39 = vpop.f32.mrb[3].mxu1  ;;  %v792_v27 = vld [vmem:[%s982_s3 + $0x30] sm:$0xff]   ;;  %v793_v28 = vld [vmem:[%s982_s3 + $0x38] sm:$0xff]   ;;  %v799_v29 = vmov 0.0   ;;  %781 = vset.pattern.permute.xlu0 %v801_v30 }
 0x1d0   :  { %v395_v41 = vadd.f32 %v387_v32, %v321_v34  ;;  %v324_v42 = vadd.f32 %v323_v39, %v247_v31  ;;  %742 = vmatprep.subr.bf16.mxu1 %v799_v29  ;;  %750 = vmatprep.mubr.msk.bf16.mxu1 %vm800_vm1, %v799_v29  ;;  %v457_v31 = vpop.permute.xlu1 %456 }
 0x1d1   :  { %v437_v44 = vadd.f32 %v413_v33, %v397_v37  ;;  %v398_v45 = vadd.f32 %v390_v36, %v332_v38  ;;  %597 = vperm.xlu0 %781, %v844_v5   ;;  %v461_v33 = vpop.permute.xlu0 %460 }
 0x1d2   :  { %v435_v46 = vadd.f32 %v405_v20, %v395_v41  ;;  %v396_v47 = vadd.f32 %v388_v40, %v324_v42 }
 0x1d3   :  { %v438_v49 = vadd.f32 %v417_v8, %v398_v45  ;;  %v445_v57 = vmax.f32 %v437_v44, 0.0 }
 0x1d4   :  { %v436_v54 = vadd.f32 %v409_v2, %v396_v47  ;;  %v724_v55 = vpop.f32.mrb[4].mxu1  ;;  %v443_v62 = vmax.f32 %v435_v46, 0.0  ;;  %v465_v32 = vpop.permute.xlu1 %464 }
 0x1d5   :  { %v446_v58 = vmax.f32 %v438_v49, 0.0  ;;  %v345_v59 = vadd.f32 %v724_v55, %v252_v48  ;;  %v336_v60 = vpop.f32.mrb[5].mxu1  ;;  %v473_v38 = vpop.permute.xlu0 %472 }
 0x1d6   :  { %v444_v63 = vmax.f32 %v436_v54, 0.0  ;;  %v337_v0 = vadd.f32 %v336_v60, %v250_v50  ;;  %v725_v1 = vpop.f32.mrb[6].mxu1 }
 0x1d7   :  { %v348_v10 = vadd.f32 %v725_v1, %v253_v52  ;;  %v339_v8 = vpop.f32.mrb[7].mxu1  ;;  %v401_v3 = vadd.f32 %v393_v56, %v345_v59  ;;  %v452_v11 = vpack.c.bf16 %v446_v58, %v445_v57 }
 0x1d8   :  { %v399_v2 = vadd.f32 %v391_v61, %v337_v0  ;;  %v340_v15 = vadd.f32 %v339_v8, %v251_v51  ;;  %v451_v12 = vpack.c.bf16 %v444_v63, %v443_v62  ;;  %v469_v34 = vpop.permute.xlu1 %468 }
 0x1d9   :  { %v402_v16 = vadd.f32 %v394_v6, %v348_v10  ;;  %v441_v17 = vadd.f32 %v429_v4, %v401_v3  ;;  %v481_v5 = vpop.permute.xlu0 %480  ;;  %v56_v4 = vld [vmem:[%s982_s3 + $0x40] sm:$0xf] }
 0x1da   :  { %v439_v18 = vadd.f32 %v421_v53, %v399_v2  ;;  %v400_v7 = vadd.f32 %v392_v13, %v340_v15  ;;  %726 = vmatprep.subr.bf16.mxu0 %v451_v12 }
 0x1db   :  { %v442_v19 = vadd.f32 %v433_v14, %v402_v16  ;;  %727 = vmatpush3.bf16.msra.mxu0 %v451_v12  ;;  %v449_v21 = vmax.f32 %v441_v17, 0.0 }
 0x1dc   :  { %v440_v20 = vadd.f32 %v425_v43, %v400_v7  ;;  %728 = vmatprep.subr.bf16.mxu0 %v452_v11  ;;  %v447_v24 = vmax.f32 %v439_v18, 0.0  ;;  %v477_v43 = vpop.permute.xlu1 %476 }
 0x1dd   :  { %v450_v23 = vmax.f32 %v442_v19, 0.0 }
 0x1de   :  { %v448_v25 = vmax.f32 %v440_v20, 0.0 }
 0x1df   :  { %v454_v26 = vpack.c.bf16 %v450_v23, %v449_v21  ;;  %729 = vmatpush3.bf16.msra.mxu0 %v452_v11 }
 0x1e0   :  { %v453_v9 = vpack.c.bf16 %v448_v25, %v447_v24  ;;  %v485_v54 = vpop.permute.xlu1 %484 }
 0x1e2   :  { %730 = vmatprep.subr.bf16.mxu0 %v453_v9 }
 0x1e3   :  { %731 = vmatpush3.bf16.msra.mxu0 %v453_v9 }
 0x1e4   :  { %732 = vmatprep.subr.bf16.mxu0 %v454_v26 }
 0x1e7   :  { %733 = vmatpush3.bf16.msra.mxu0 %v454_v26 }
 0x1ea   :  { %735 = vmatmul.mubr.msk.bf16.vlgmr.msra.gmra.mrb[8].mxu0 %vm117_vm0, %v791_v22 }
 0x1eb   :  { %738 = vmatprep.mubr.msk.bf16.mxu0 %vm117_vm0, %v792_v27 }
 0x1f2   :  { %739 = vmatmul.mubr.msk.bf16.gmra.mrb[12].mxu0 %vm117_vm0, %v793_v28 }
 0x250   :  { %v598_v6 = vpop.permute.xlu0 %597 }
 0x2bd   :  { %v736_v35 = vpop.f32.mrb[8].mxu0 }
 0x2be   :  { %v562_v36 = vadd.f32 %v736_v35, %v465_v32  ;;  %v553_v37 = vpop.f32.mrb[9].mxu0 }
 0x2bf   :  { %v554_v39 = vadd.f32 %v553_v37, %v457_v31  ;;  %v737_v40 = vpop.f32.mrb[10].mxu0 }
 0x2c0   :  { %v565_v41 = vadd.f32 %v737_v40, %v469_v34  ;;  %v556_v42 = vpop.f32.mrb[11].mxu0  ;;  %v586_v45 = vmax.f32 %v562_v36, 0.0 }
 0x2c1   :  { %v557_v44 = vadd.f32 %v556_v42, %v461_v33  ;;  %v584_v47 = vmax.f32 %v554_v39, 0.0 }
 0x2c2   :  { %v587_v46 = vmax.f32 %v565_v41, 0.0 }
 0x2c3   :  { %v585_v48 = vmax.f32 %v557_v44, 0.0 }
 0x2c4   :  { %v593_v49 = vpack.c.bf16 %v587_v46, %v586_v45 }
 0x2c5   :  { %v592_v50 = vpack.c.bf16 %v585_v48, %v584_v47  ;;  %v740_v51 = vpop.f32.mrb[12].mxu0 }
 0x2c6   :  { %v578_v52 = vadd.f32 %v740_v51, %v481_v5  ;;  %v569_v53 = vpop.f32.mrb[13].mxu0 }
 0x2c7   :  { %v570_v55 = vadd.f32 %v569_v53, %v473_v38  ;;  %v741_v56 = vpop.f32.mrb[14].mxu0  ;;  %743 = vmatpush3.bf16.msra.mxu1 %v592_v50 }
 0x2c8   :  { %v581_v57 = vadd.f32 %v741_v56, %v485_v54  ;;  %v572_v58 = vpop.f32.mrb[15].mxu0  ;;  %744 = vmatprep.subr.bf16.mxu1 %v799_v29  ;;  %v590_v60 = vmax.f32 %v578_v52, 0.0 }
 0x2c9   :  { %v573_v59 = vadd.f32 %v572_v58, %v477_v43  ;;  %v588_v62 = vmax.f32 %v570_v55, 0.0 }
 0x2ca   :  { %v591_v61 = vmax.f32 %v581_v57, 0.0 }
 0x2cb   :  { %v589_v63 = vmax.f32 %v573_v59, 0.0  ;;  %745 = vmatpush3.bf16.msra.mxu1 %v593_v49 }
 0x2cc   :  { %v595_v0 = vpack.c.bf16 %v591_v61, %v590_v60  ;;  %746 = vmatprep.subr.bf16.mxu1 %v799_v29 }
 0x2cd   :  { %v594_v1 = vpack.c.bf16 %v589_v63, %v588_v62 }
 0x2cf   :  { %747 = vmatpush3.bf16.msra.mxu1 %v594_v1 }
 0x2d0   :  { %748 = vmatprep.subr.bf16.mxu1 %v799_v29 }
 0x2d3   :  { %749 = vmatpush3.bf16.msra.mxu1 %v595_v0 }
 0x2d6   :  { %751 = vmatmul.mubr.msk.bf16.vlgmr.msra.gmra.mrb[8].mxu1 %vm117_vm0, %v56_v4 }
 0x3a9   :  { %v637_v10 = vpop.f32.mrb[8].mxu1 }
 0x3aa   :  { %v638_v8 = vadd.f32 %v637_v10, %v598_v6  ;;  %v752_v3 = vpop.f32.mrb[9].mxu1 }
 0x3ab   :  { %v640_v11 = vpop.f32.mrb[10].mxu1 }
 0x3ac   :  { %644 = vst.msk [vmem:[%s984_s5] sm:$0xff] %vm643_vm2, %v638_v8  ;;  %v753_v13 = vpop.f32.mrb[11].mxu1 }

</bundles_post_ra>
